<compile_context>
chip_gen: v7x
topology: tpu7x:2x2x1
jax: 0.10.0
libtpu: 0.0.40
codegen_flags: <defaults>
</compile_context>

<pallas_src>
import functools

import jax
import jax.numpy as jnp
from jax.experimental import pallas as pl
from jax.experimental.pallas import tpu as pltpu

IN_FEATURES = 64
OUT_FEATURES = 10
OUT_PADDED = 128          # lane-dense output width (multiple of 128)
DEFAULT_TILE_B = 256      # batch tile (multiple of 8; capped to padded B)


def _round_up(x: int, m: int) -> int:
    return (x + m - 1) // m * m


def linear_kernel(x_ref, w_ref, b_ref, o_ref):
    # x_ref: (TILE_B, 64), w_ref: (64, 128), b_ref: (1, 128), o_ref: (TILE_B, 128)
    acc = jnp.dot(x_ref[...], w_ref[...], preferred_element_type=jnp.float32)
    o_ref[...] = (acc + b_ref[...]).astype(o_ref.dtype)


def prepare_params(weight, bias):
    """Hoisted parameter prep: do this ONCE, not per forward call.

    weight: (10, 64) PyTorch layout; bias: (10,).
    Returns W^T zero-padded to (64, 128) and bias padded to (1, 128).
    """
    w_t = weight.T                                             # (64, 10)
    w_t_padded = jnp.zeros((IN_FEATURES, OUT_PADDED), weight.dtype)
    w_t_padded = w_t_padded.at[:, :OUT_FEATURES].set(w_t)      # (64, 128)
    b_padded = jnp.zeros((1, OUT_PADDED), bias.dtype)
    b_padded = b_padded.at[0, :OUT_FEATURES].set(bias)         # (1, 128)
    return w_t_padded, b_padded


@functools.partial(jax.jit, static_argnames=("tile_b",))
def mlp2_forward(x, w_t_padded, b_padded, *, tile_b=DEFAULT_TILE_B):
    """x: (B, 64) f32; w_t_padded: (64, 128); b_padded: (1, 128). Returns (B, 10)."""
    B = x.shape[0]
    tile_b = min(tile_b, _round_up(B, 8))     # keep tiles >= 8 rows, <= DEFAULT_TILE_B
    Bp = _round_up(B, tile_b)
    if Bp != B:
        x = jnp.pad(x, ((0, Bp - B), (0, 0)))

    grid = (Bp // tile_b,)
    flops = 2 * Bp * IN_FEATURES * OUT_PADDED
    bytes_accessed = (
        Bp * IN_FEATURES * 4            # x
        + IN_FEATURES * OUT_PADDED * 4  # W^T (padded)
        + OUT_PADDED * 4                # bias
        + Bp * OUT_PADDED * 4           # out (padded)
    )

    out_padded = pl.pallas_call(
        linear_kernel,
        out_shape=jax.ShapeDtypeStruct((Bp, OUT_PADDED), x.dtype),
        grid_spec=pltpu.PrefetchScalarGridSpec(
            num_scalar_prefetch=0,
            grid=grid,
            in_specs=[
                pl.BlockSpec((tile_b, IN_FEATURES), lambda i: (i, 0)),
                pl.BlockSpec((IN_FEATURES, OUT_PADDED), lambda i: (0, 0)),
                pl.BlockSpec((1, OUT_PADDED), lambda i: (0, 0)),
            ],
            out_specs=pl.BlockSpec((tile_b, OUT_PADDED), lambda i: (i, 0)),
        ),
        compiler_params=pltpu.CompilerParams(
            dimension_semantics=("parallel",)),
        cost_estimate=pl.CostEstimate(
            flops=flops, transcendentals=0, bytes_accessed=bytes_accessed),
    )(x, w_t_padded, b_padded)

    return out_padded[:B, :OUT_FEATURES]


if __name__ == "__main__":
    key = jax.random.PRNGKey(0)

    B = 8
    x = jax.random.normal(key, (B, IN_FEATURES), dtype=jnp.float32)

    # Parameters exactly as in the PyTorch module: filled with 0.01.
    weight = jnp.full((OUT_FEATURES, IN_FEATURES), 0.01, dtype=jnp.float32)
    bias = jnp.full((OUT_FEATURES,), 0.01, dtype=jnp.float32)

    # Hoisted out of the per-call forward path (done once at "init").
    w_t_padded, b_padded = prepare_params(weight, bias)

    out = mlp2_forward(x, w_t_padded, b_padded)
    out = jax.block_until_ready(out)

    # Correctness check against plain-JAX reference of the same forward.
    ref = x @ weight.T + bias
    assert out.shape == (B, OUT_FEATURES)
    assert jnp.allclose(out, ref, atol=1e-5, rtol=1e-5)

    # TODO(synk): the weight.register_hook gradient-print in __init__ is a
    # training-time side effect with no forward-pass / Pallas equivalent.
    print("KERNEL_OK")
</pallas_src>

<mosaic_0001>
module attributes {stable_mosaic.version = 11 : i64} {
  func.func @linear_kernel(%arg0: i32, %arg1: memref<8x64xf32, #tpu.memory_space<vmem>>, %arg2: memref<64x128xf32, #tpu.memory_space<vmem>>, %arg3: memref<1x128xf32, #tpu.memory_space<vmem>>, %arg4: memref<8x128xf32, #tpu.memory_space<vmem>>) attributes {dimension_semantics = [#tpu.dimension_semantics<parallel>], iteration_bounds = array<i64: 1>, scalar_prefetch = 0 : i64, scratch_operands = 0 : i64, tpu.core_type = #tpu.core_type<tc>, window_params = [{transform_indices = @transform_0, window_bounds = array<i64: 8, 64>}, {pipeline_mode = #tpu.pipeline_mode<synchronous>, transform_indices = @transform_1, window_bounds = array<i64: 64, 128>}, {pipeline_mode = #tpu.pipeline_mode<synchronous>, transform_indices = @transform_2, window_bounds = array<i64: 1, 128>}, {transform_indices = @transform_3, window_bounds = array<i64: 8, 128>}]} {
    %c0 = arith.constant 0 : index
    %c0_0 = arith.constant 0 : index
    %0 = vector.load %arg1[%c0, %c0_0] : memref<8x64xf32, #tpu.memory_space<vmem>>, vector<8x64xf32>
    %c0_1 = arith.constant 0 : index
    %c0_2 = arith.constant 0 : index
    %1 = vector.load %arg2[%c0_1, %c0_2] : memref<64x128xf32, #tpu.memory_space<vmem>>, vector<64x128xf32>
    %cst = arith.constant dense<0.000000e+00> : vector<8x128xf32>
    %2 = tpu.matmul %0, %1, %cst {dimension_numbers = #tpu.dot_dimension_numbers<[1], [0], [0], [1], [0, 0, 1, 1], [], []>} : vector<8x64xf32>, vector<64x128xf32>, vector<8x128xf32> -> vector<8x128xf32>
    %c0_3 = arith.constant 0 : index
    %c0_4 = arith.constant 0 : index
    %3 = vector.load %arg3[%c0_3, %c0_4] : memref<1x128xf32, #tpu.memory_space<vmem>>, vector<1x128xf32>
    %4 = vector.broadcast %3 : vector<1x128xf32> to vector<8x128xf32>
    %5 = arith.addf %2, %4 : vector<8x128xf32>
    %c0_5 = arith.constant 0 : index
    %c0_6 = arith.constant 0 : index
    %6 = vector.load %arg4[%c0_5, %c0_6] : memref<8x128xf32, #tpu.memory_space<vmem>>, vector<8x128xf32>
    tpu.vector_store %arg4[%c0_5, %c0_6], %5 {strides = array<i32>} : memref<8x128xf32, #tpu.memory_space<vmem>>, vector<8x128xf32>,
    return
  }
  func.func @transform_0(%arg0: i32) -> (i32, i32) {
    %c0_i32 = arith.constant 0 : i32
    %c0_i32_0 = arith.constant 0 : i32
    return %arg0, %c0_i32 : i32, i32
  }
  func.func @transform_1(%arg0: i32) -> (i32, i32) {
    %c0_i32 = arith.constant 0 : i32
    %c0_i32_0 = arith.constant 0 : i32
    %c0_i32_1 = arith.constant 0 : i32
    return %c0_i32, %c0_i32_0 : i32, i32
  }
  func.func @transform_2(%arg0: i32) -> (i32, i32) {
    %c0_i32 = arith.constant 0 : i32
    %c0_i32_0 = arith.constant 0 : i32
    %c0_i32_1 = arith.constant 0 : i32
    return %c0_i32, %c0_i32_0 : i32, i32
  }
  func.func @transform_3(%arg0: i32) -> (i32, i32) {
    %c0_i32 = arith.constant 0 : i32
    %c0_i32_0 = arith.constant 0 : i32
    return %arg0, %c0_i32 : i32, i32
  }
}

</mosaic_0001>

<bundles_post_ra>
// kernel: mlp2_forward.1
= control target key start
LH: loop header
LB: loop body
LE: loop exit
PB: predicated region body
PF: predicated region fallthrough
CT: control target
= control target key end

     0   :  { %8 = vsyncpa [#allocation3], 0  ;;  %s344_s0 = inlined_call_operand.hbm [shape: f32[8,64], index: 0, kind: input, shape index: {}]   ;;  %s345_s1 = inlined_call_operand.hbm [shape: f32[64,128], index: 1, kind: input, shape index: {}]   ;;  %s346_s2 = inlined_call_operand.vmem [shape: f32[1,128], index: 2, kind: input, shape index: {}]   ;;  %s347_s3 = inlined_call_operand.hbm [shape: f32[8,128], index: 3, kind: output, shape index: {}]  }
   0x1   :  { %9 = vsyncpa [#allocation6], 0 }
   0x2   :  { %10 = vsyncpa [#allocation4], 0  ;;  %s270_s12 = smov [#allocation2]   ;;  %s271_s14 = smov [#allocation5]  }
   0x3   :  { %s17_s13 = sshll.u32 %s270_s12, 4  ;;  %s26_s15 = sshll.u32 %s271_s14, 4  ;;  %s18_s13 = int_to_ptr.vmem [resolvable:$true] %s17_s13  ;;  %s298_s15 = int_to_ptr.vmem [resolvable:$true] %s26_s15 }
   0x4   :  { %s198_s18 = scalar_lea.hbm %s344_s0, 128 }
   0x5   :  { %p199_p0 = scmp.ne.s32.totalorder %s344_s0, %s198_s18  ;;  %p202_p1 = scmp.lt.u32.totalorder %s198_s18, %s344_s0 }
   0x7   :  { %p204_p2 = pnand %p202_p1, %p199_p0 }
   0x9   :  { %207 = shalt.err (!%p204_p2)
}
   0xa   :  { %s208_s23 = scalar_lea.vmem %s18_s13, 128  ;;  %p213_p4 = scmp.lt.s32.totalorder %s18_s13, %s18_s13 }
   0xb   :  { %p209_p3 = scmp.ne.s32.totalorder %s18_s13, %s208_s23  ;;  %p214_p5 = scmp.lt.s32.totalorder %s208_s23, %s208_s23 }
   0xd   :  { %p215_p6 = por %p214_p5, %p213_p4 }
   0xf   :  { %p216_p7 = pnand %p215_p6, %p209_p3 }
  0x11   :  { %219 = shalt.err (!%p216_p7)
}
  0x12   :  { %20 = dma.hbm_to_vmem [thread:$0]  %s344_s0, 128, %s18_s13, [#allocation3]  }
  0x13   :  { %s220_s28 = scalar_lea.hbm %s345_s1, 1024 }
  0x14   :  { %p221_p8 = scmp.ne.s32.totalorder %s345_s1, %s220_s28  ;;  %p224_p9 = scmp.lt.u32.totalorder %s220_s28, %s345_s1 }
  0x16   :  { %p226_p10 = pnand %p224_p9, %p221_p8 }
  0x18   :  { %229 = shalt.err (!%p226_p10)
}
  0x19   :  { %s230_s6 = scalar_lea.vmem %s298_s15, 1024  ;;  %p235_p12 = scmp.lt.s32.totalorder %s298_s15, %s298_s15 }
  0x1a   :  { %p231_p11 = scmp.ne.s32.totalorder %s298_s15, %s230_s6  ;;  %p236_p13 = scmp.lt.s32.totalorder %s230_s6, %s230_s6 }
  0x1c   :  { %p237_p0 = por %p236_p13, %p235_p12 }
  0x1e   :  { %p238_p1 = pnand %p237_p0, %p231_p11 }
  0x20   :  { %241 = shalt.err (!%p238_p1)
}
  0x21   :  { %s272_s0 = smov 128   ;;  %s273_s7 = smov 8  }
  0x22   :  { %32 = dma.hbm_to_vmem [thread:$0]  %s345_s1, 1024, %s298_s15, [#allocation6], %s272_s0, %s272_s0, %s273_s7  }
  0x23   :  { %264 = dma.done.wait [#allocation3], 128  }
  0x24   :  { %265 = vsyncadd [#allocation3], 4294967168 }
  0x25   :  { %266 = dma.done.wait [#allocation6], 1024  }
  0x26   :  { %267 = vsyncadd [#allocation6], 4294966272  ;;  %v274_v0 = vmov 0.0|0.0   ;;  %vm275_vm0 = vmmov 0   ;;  %v276_v1 = vmov 0.0   ;;  %v42_v2 = vld [vmem:[#allocation5] sm:$0xff] }
  0x27   :  { %178 = vmatprep.subr.bf16.mxu0 %v274_v0  ;;  %175 = vmatprep.mubr.msk.f32.mxu0 %vm275_vm0, %v276_v1  ;;  %v43_v3 = vld [vmem:[#allocation5 + $0x8] sm:$0xff]  ;;  %v44_v4 = vld [vmem:[#allocation5 + $0x10] sm:$0xff]  ;;  %v45_v6 = vld [vmem:[#allocation5 + $0x18] sm:$0xff]  ;;  %vm57_vm1 = vcmask 523264   ;;  %s277_s11 = smov [#allocation7]  }
  0x28   :  { %v179_v5 = vpack.c.bf16 %v43_v3, %v42_v2  ;;  %v182_v7 = vpack.c.bf16 %v45_v6, %v44_v4  ;;  %v46_v8 = vld [vmem:[#allocation5 + $0x20] sm:$0xff]  ;;  %v47_v9 = vld [vmem:[#allocation5 + $0x28] sm:$0xff]  ;;  %v48_v11 = vld [vmem:[#allocation5 + $0x30] sm:$0xff]  ;;  %s138_s12 = sshll.u32 %s277_s11, 4  ;;  %s139_s12 = int_to_ptr.vmem [resolvable:$true] %s138_s12 }
  0x29   :  { %v185_v10 = vpack.c.bf16 %v47_v9, %v46_v8  ;;  %v49_v12 = vld [vmem:[#allocation5 + $0x38] sm:$0xff]  ;;  %s242_s13 = scalar_lea.vmem %s139_s12, 128  ;;  %p247_p3 = scmp.lt.s32.totalorder %s139_s12, %s139_s12 }
  0x2a   :  { %180 = vmatpush3.bf16.msra.mxu0 %v179_v5  ;;  %v188_v13 = vpack.c.bf16 %v49_v12, %v48_v11  ;;  %v41_v14 = vld [vmem:[#allocation2] sm:$0xff]  ;;  %p243_p2 = scmp.ne.s32.totalorder %s139_s12, %s242_s13  ;;  %p248_p4 = scmp.lt.s32.totalorder %s242_s13, %s242_s13 }
  0x2b   :  { %181 = vmatprep.subr.bf16.mxu0 %v274_v0  ;;  %v148_v15 = vld [vmem:[%s346_s2] ss:$0 sm:$0xff] }
  0x2c   :  { %p249_p5 = por %p248_p4, %p247_p3 }
  0x2e   :  { %183 = vmatpush3.bf16.msra.mxu0 %v182_v7  ;;  %p250_p6 = pnand %p249_p5, %p243_p2 }
  0x2f   :  { %184 = vmatprep.subr.bf16.mxu0 %v274_v0 }
  0x32   :  { %186 = vmatpush3.bf16.msra.mxu0 %v185_v10 }
  0x33   :  { %187 = vmatprep.subr.bf16.mxu0 %v274_v0 }
  0x36   :  { %189 = vmatpush3.bf16.msra.mxu0 %v188_v13 }
  0x39   :  { %176 = vmatmul.mubr.msk.f32.vlgmr.msra.gmra.mrb[0].mxu0 %vm57_vm1, %v41_v14 }
 0x10c   :  { %v127_v16 = vpop.f32.mrb[0].mxu0 }
 0x10d   :  { %v128_v17 = vadd.f32 %v148_v15, %v127_v16  ;;  %v177_v18 = vpop.f32.mrb[1].mxu0 }
 0x10f   :  { %131 = vst [vmem:[#allocation7] sm:$0xff] %v128_v17 }
 0x110   :  { %253 = shalt.err (!%p250_p6)
}
 0x111   :  { %s254_s16 = scalar_lea.hbm %s347_s3, 128 }
 0x112   :  { %p255_p7 = scmp.ne.s32.totalorder %s347_s3, %s254_s16  ;;  %p258_p8 = scmp.lt.u32.totalorder %s254_s16, %s347_s3 }
 0x114   :  { %p260_p9 = pnand %p258_p8, %p255_p7 }
 0x116   :  { %263 = shalt.err (!%p260_p9)
}
 0x117   :  { %141 = dma.vmem_to_hbm [thread:$0]  %s139_s12, 128, %s347_s3, [#allocation4]  }
 0x118   :  { %268 = dma.done.wait [#allocation4], 128  }
 0x119   :  { %269 = vsyncadd [#allocation4], 4294967168 }
 0x11a   :  { %145 = vsyncpa [#allocation3], 1 }
 0x11b   :  { %146 = vsyncpa [#allocation6], 1 }
 0x11c   :  { %147 = vsyncpa [#allocation4], 1 }

</bundles_post_ra>
